<compile_context>
chip_gen: v6e
topology: v6e:2x2x1
jax: 0.10.0
libtpu: 0.0.40
codegen_flags: <defaults>
</compile_context>

<pallas_src>
import jax
import jax.numpy as jnp
from jax.experimental import pallas as pl
from jax.experimental.pallas import tpu as pltpu

_HALO = 128  # halo width in lanes (>= receptive field of 4, lane-aligned).
             # Invariant: _HALO >= 4 keeps roll wraparound out of the consumed region.


def _lka_body(xl_ref, xc_ref, xr_ref, dw_ref, dwd_ref, pw_ref, pb_ref, o_ref,
              xw_ref, carry_ref, *, seq_len, tile_l, use_carry, mxu_bf16):
    """One (batch, L-tile) grid step.  All blocks are (C, lanes) in NCL layout."""
    li = pl.program_id(1)
    n_l = pl.num_programs(1)
    c, w = xw_ref.shape
    is_first = li == 0
    is_last = li == n_l - 1

    # ---- 1. Assemble the extended window [left halo | tile | right halo(+pad)]
    #         in the xw VMEM scratch with ref stores (no concatenate).  The
    #         sequence-boundary zero padding of x is realized with pl.when-gated
    #         128-lane stores, so interior tiles never touch a mask here.
    if use_carry:
        @pl.when(is_first)
        def _():
            carry_ref[...] = jnp.zeros_like(carry_ref)
        xw_ref[:, 0:_HALO] = carry_ref[...]
    else:
        @pl.when(is_first)
        def _():
            xw_ref[:, 0:_HALO] = jnp.zeros((c, _HALO), xw_ref.dtype)

        @pl.when(jnp.logical_not(is_first))
        def _():
            xw_ref[:, 0:_HALO] = xl_ref[0]

    xc = xc_ref[0]                                     # (C, tile_l)
    xw_ref[:, _HALO:_HALO + tile_l] = xc

    @pl.when(jnp.logical_not(is_last))
    def _():
        xw_ref[:, _HALO + tile_l:_HALO + tile_l + _HALO] = xr_ref[0]

    @pl.when(is_last)
    def _():
        xw_ref[:, _HALO + tile_l:] = jnp.zeros((c, w - _HALO - tile_l), xw_ref.dtype)

    if use_carry and tile_l >= _HALO:
        # Save the last _HALO lanes of this tile as the next tile's left halo.
        @pl.when(jnp.logical_not(is_last))
        def _():
            carry_ref[...] = xc[:, tile_l - _HALO:]

    x_ext = xw_ref[...].astype(jnp.float32)            # (C, W)

    # ---- 2. Depthwise conv, k=3, pad=1: y[l] = w0*x[l-1] + w1*x[l] + w2*x[l+1]
    #         (rolls are XLU ops; wrapped lanes never reach the consumed region
    #          because _HALO = 128 >= the 4-lane receptive field).
    dwv = dw_ref[...].astype(jnp.float32)              # (C, 3)
    y = (dwv[:, 0:1] * pltpu.roll(x_ext, 1, axis=1)
         + dwv[:, 1:2] * x_ext
         + dwv[:, 2:3] * pltpu.roll(x_ext, w - 1, axis=1))

    # dw's output must be exactly zero outside [0, seq_len) before the dilated
    # conv (PyTorch zero-pads y itself, not conv(zero-padded x)).  Only the
    # first / last tiles can contain such positions, so the (1, W) lane mask is
    # forced all-true on interior tiles: a single full-width select per step.
    lane = jax.lax.broadcasted_iota(jnp.int32, (1, w), 1)
    gpos = lane + (li * tile_l - _HALO)                # global sequence position
    ok = (gpos >= 0) & (gpos < seq_len)
    ok = jnp.logical_or(ok, jnp.logical_not(jnp.logical_or(is_first, is_last)))
    y = jnp.where(ok, y, 0.0)

    # ---- 3. Dilated depthwise conv, k=3, d=3, pad=3:
    #         z[l] = v0*y[l-3] + v1*y[l] + v2*y[l+3]
    dwdv = dwd_ref[...].astype(jnp.float32)            # (C, 3)
    z = (dwdv[:, 0:1] * pltpu.roll(y, 3, axis=1)
         + dwdv[:, 1:2] * y
         + dwdv[:, 2:3] * pltpu.roll(y, w - 3, axis=1))
    z_c = z[:, _HALO:_HALO + tile_l]                   # 128-aligned center slice

    # ---- 4. Pointwise 1x1 conv with bias on the MXU: atten = W @ z + b
    if mxu_bf16:
        atten = jnp.dot(pw_ref[...].astype(jnp.bfloat16), z_c.astype(jnp.bfloat16),
                        preferred_element_type=jnp.float32)
    else:
        atten = jnp.dot(pw_ref[...].astype(jnp.float32), z_c,
                        preferred_element_type=jnp.float32)
    atten = atten + pb_ref[...].astype(jnp.float32)    # (C, 1) broadcasts over lanes

    # ---- 5. Gate.
    o_ref[0] = (xc.astype(jnp.float32) * atten).astype(o_ref.dtype)


def large_kernel_attention(x_ncl, dw_w, dwd_w, point_w, point_b, *, l_tile=None):
    """LargeKernelAttention forward.

    x_ncl:   [B, C, L]  (same NCL layout as the PyTorch module)
    dw_w:    [C, 3]  or [C, 1, 3]   depthwise weights    (torch: dw.weight)
    dwd_w:   [C, 3]  or [C, 1, 3]   dilated depthwise    (torch: dwd.weight)
    point_w: [C, C]  or [C, C, 1]   1x1 conv weight      (torch: point.weight)
    point_b: [C]                    1x1 conv bias
    l_tile:  optional cap on the L tile width (mainly for testing)
    returns  [B, C, L]
    """
    b, c, l = x_ncl.shape
    dw = dw_w.reshape(c, 3)
    dwd = dwd_w.reshape(c, 3)
    pw = point_w.reshape(c, c)
    pb = point_b.reshape(c, 1)
    ds = jnp.dtype(x_ncl.dtype).itemsize

    # ---- VMEM budgeting (generation-aware: v5e/v6e 128 MiB, v7x 64 MiB). ----
    try:
        vmem_cap = int(pltpu.get_tpu_info().vmem_capacity_bytes)
    except Exception:
        vmem_cap = 64 * 1024 * 1024                    # conservative default (v7x)
    vmem_limit = int(min(vmem_cap * 3 // 4, 96 * 1024 * 1024))
    budget = int(vmem_limit * 0.85)

    def footprint(tl):
        """Rough per-step VMEM bytes for an L tile of width tl."""
        win_ = 2 * _HALO + tl + ((-tl) % _HALO)
        return (4 * c * tl * ds                  # x tile + output, double-buffered
                + 4 * c * _HALO * ds             # halo block(s), double-buffered
                + c * (win_ + _HALO) * ds        # extended-window + carry scratch
                + 3 * c * win_ * 4               # f32 temporaries (x_ext / y / z)
                + 2 * (c * c + 7 * c) * ds)      # weights (worst case double-buffered)

    # ---- Tile selection: largest first; one halo-free tile whenever L fits. ----
    candidates = [l]
    if l % 128 == 0:
        candidates += [t for t in (4096, 2048, 1024, 512, 256, 128)
                       if t < l and l % t == 0]
    if l_tile is not None:
        capped = [t for t in candidates if t <= int(l_tile)]
        candidates = capped if capped else [candidates[-1]]
    if b == 1 and len(candidates) > 1 and candidates[0] == l:
        # Keep >= 2 L tiles so both v7x TensorCores get parallel grid work.
        candidates = candidates[1:] + candidates[:1]
    tile_l = next((t for t in candidates if footprint(t) <= budget), candidates[-1])
    # TODO(synk): very long sequences with L % 128 != 0 fall back to one full-L
    # tile and may exceed the VMEM budget; pad L on the host if that ever occurs.
    n_l = l // tile_l
    win = 2 * _HALO + tile_l + ((-tile_l) % _HALO)

    # Left-halo strategy: carry it in VMEM (L axis "arbitrary") when B alone
    # provides >= 2 parallel grid units; otherwise keep L "parallel" and read a
    # clamped left-halo block instead.
    use_carry = not (b == 1 and n_l >= 2)
    dims = ("parallel", "arbitrary") if use_carry else ("parallel", "parallel")
    mxu_bf16 = x_ncl.dtype == jnp.bfloat16

    if n_l > 1:
        kb = tile_l // _HALO                   # 128-lane blocks per L tile
        n_halo = l // _HALO                    # 128-lane blocks along L
        xr_arr = x_ncl
        xr_spec = pl.BlockSpec(
            (1, c, _HALO),
            lambda bi, li: (bi, 0, jnp.minimum((li + 1) * kb, n_halo - 1)))
        xl_spec = pl.BlockSpec(
            (1, c, _HALO),
            lambda bi, li: (bi, 0, jnp.maximum(li * kb - 1, 0)))
    else:
        xr_arr = jnp.zeros((1, c, _HALO), x_ncl.dtype)   # never read (is_last)
        xr_spec = pl.BlockSpec((1, c, _HALO), lambda bi, li: (0, 0, 0))
        xl_spec = None                                   # single tile => carry mode

    kernel_kw = dict(seq_len=l, tile_l=tile_l, use_carry=use_carry, mxu_bf16=mxu_bf16)
    if use_carry:
        def kernel(xc, xr, dwr, dwdr, pwr, pbr, o, xw, cr):
            _lka_body(None, xc, xr, dwr, dwdr, pwr, pbr, o, xw, cr, **kernel_kw)
    else:
        def kernel(xl, xc, xr, dwr, dwdr, pwr, pbr, o, xw, cr):
            _lka_body(xl, xc, xr, dwr, dwdr, pwr, pbr, o, xw, cr, **kernel_kw)

    cost = pl.CostEstimate(
        flops=2 * b * c * c * l + 20 * b * c * l,
        transcendentals=0,
        bytes_accessed=(2 * b * c * l + c * c + 8 * c) * ds)

    def build(single_buffer_weights):
        wkw = dict(pipeline_mode=pl.Buffered(1)) if single_buffer_weights else {}
        in_specs, args = [], []
        if not use_carry:
            in_specs.append(xl_spec)
            args.append(x_ncl)
        in_specs += [
            pl.BlockSpec((1, c, tile_l), lambda bi, li: (bi, 0, li)),   # x tile
            xr_spec,                                                    # right halo
            pl.BlockSpec((c, 3), lambda bi, li: (0, 0), **wkw),         # dw weights
            pl.BlockSpec((c, 3), lambda bi, li: (0, 0), **wkw),         # dwd weights
            pl.BlockSpec((c, c), lambda bi, li: (0, 0), **wkw),         # point weight
            pl.BlockSpec((c, 1), lambda bi, li: (0, 0), **wkw),         # point bias
        ]
        args += [x_ncl, xr_arr, dw, dwd, pw, pb]
        return pl.pallas_call(
            kernel,
            out_shape=jax.ShapeDtypeStruct((b, c, l), x_ncl.dtype),
            grid_spec=pltpu.PrefetchScalarGridSpec(
                num_scalar_prefetch=0,
                grid=(b, n_l),
                in_specs=in_specs,
                out_specs=pl.BlockSpec((1, c, tile_l), lambda bi, li: (bi, 0, li)),
                scratch_shapes=[
                    pltpu.VMEM((c, win), x_ncl.dtype),    # extended window
                    pltpu.VMEM((c, _HALO), x_ncl.dtype),  # left-halo carry
                ]),
            compiler_params=pltpu.CompilerParams(
                dimension_semantics=dims,
                vmem_limit_bytes=vmem_limit),
            cost_estimate=cost,
        )(*args)

    try:
        return build(True)
    except Exception:
        # pl.Buffered(1) single-buffering not supported on this jax/backend.
        return build(False)


def _reference(x_ncl, dw_w, dwd_w, point_w, point_b):
    """Pure-JAX reference via lax.conv_general_dilated (matches PyTorch conv1d)."""
    b, c, l = x_ncl.shape
    dn = jax.lax.conv_dimension_numbers((b, c, l), (c, 1, 3), ("NCH", "OIH", "NCH"))
    y = jax.lax.conv_general_dilated(
        x_ncl, dw_w.reshape(c, 1, 3), window_strides=(1,), padding=[(1, 1)],
        dimension_numbers=dn, feature_group_count=c)
    z = jax.lax.conv_general_dilated(
        y, dwd_w.reshape(c, 1, 3), window_strides=(1,), padding=[(3, 3)],
        rhs_dilation=(3,), dimension_numbers=dn, feature_group_count=c)
    atten = jnp.einsum("bcl,oc->bol", z, point_w.reshape(c, c)) + point_b[None, :, None]
    return x_ncl * atten


if __name__ == "__main__":
    def make_inputs(key, b, c, l):
        kx, k1, k2, k3, k4 = jax.random.split(key, 5)
        x = jax.random.normal(kx, (b, c, l), dtype=jnp.float32)
        dw_w = jax.random.normal(k1, (c, 3), dtype=jnp.float32) * 0.2
        dwd_w = jax.random.normal(k2, (c, 3), dtype=jnp.float32) * 0.2
        point_w = jax.random.normal(k3, (c, c), dtype=jnp.float32) * 0.2
        point_b = jax.random.normal(k4, (c,), dtype=jnp.float32) * 0.1
        return x, dw_w, dwd_w, point_w, point_b

    k1, k2, k3, k4 = jax.random.split(jax.random.PRNGKey(0), 4)

    # 1) Small, unaligned L -> single full-L tile with zero halos.
    a1 = make_inputs(k1, 2, 8, 16)
    o1 = jax.block_until_ready(large_kernel_attention(*a1))
    assert o1.shape == (2, 8, 16)
    assert jnp.allclose(o1, _reference(*a1), atol=1e-4, rtol=1e-4), "case1 mismatch"

    # 2) 128-aligned L that fits one tile -> single halo-free tile (no halo reads).
    a2 = make_inputs(k2, 2, 16, 512)
    o2 = jax.block_until_ready(large_kernel_attention(*a2))
    assert jnp.allclose(o2, _reference(*a2), atol=1e-4, rtol=1e-4), "case2 mismatch"

    # 3) Forced multi-tile with B >= 2 -> left halo carried in VMEM scratch,
    #    L axis "arbitrary", interior tiles skip boundary masking.
    a3 = make_inputs(k3, 2, 8, 512)
    o3 = jax.block_until_ready(large_kernel_attention(*a3, l_tile=128))
    assert jnp.allclose(o3, _reference(*a3), atol=1e-4, rtol=1e-4), "case3 mismatch"

    # 4) B == 1 multi-tile -> clamped left-halo blocks, both grid axes "parallel".
    a4 = make_inputs(k4, 1, 8, 256)
    o4 = jax.block_until_ready(large_kernel_attention(*a4))
    assert jnp.allclose(o4, _reference(*a4), atol=1e-4, rtol=1e-4), "case4 mismatch"

    print("KERNEL_OK")
</pallas_src>

<mosaic_0001>
module attributes {stable_mosaic.version = 11 : i64} {
  func.func @kernel(%arg0: i32, %arg1: i32, %arg2: memref<1x8x16xf32, #tpu.memory_space<vmem>>, %arg3: memref<1x8x128xf32, #tpu.memory_space<vmem>>, %arg4: memref<8x3xf32, #tpu.memory_space<vmem>>, %arg5: memref<8x3xf32, #tpu.memory_space<vmem>>, %arg6: memref<8x8xf32, #tpu.memory_space<vmem>>, %arg7: memref<8x1xf32, #tpu.memory_space<vmem>>, %arg8: memref<1x8x16xf32, #tpu.memory_space<vmem>>, %arg9: memref<8x384xf32, #tpu.memory_space<vmem>>, %arg10: memref<8x128xf32, #tpu.memory_space<vmem>>) attributes {dimension_semantics = [#tpu.dimension_semantics<parallel>, #tpu.dimension_semantics<arbitrary>], iteration_bounds = array<i64: 2, 1>, scalar_prefetch = 0 : i64, scratch_operands = 2 : i64, tpu.core_type = #tpu.core_type<tc>, window_params = [{transform_indices = @transform_0, window_bounds = array<i64: 1, 8, 16>}, {pipeline_mode = #tpu.pipeline_mode<synchronous>, transform_indices = @transform_1, window_bounds = array<i64: 1, 8, 128>}, {pipeline_mode = #tpu.pipeline_mode<synchronous>, transform_indices = @transform_2, window_bounds = array<i64: 8, 3>}, {pipeline_mode = #tpu.pipeline_mode<synchronous>, transform_indices = @transform_3, window_bounds = array<i64: 8, 3>}, {pipeline_mode = #tpu.pipeline_mode<synchronous>, transform_indices = @transform_4, window_bounds = array<i64: 8, 8>}, {pipeline_mode = #tpu.pipeline_mode<synchronous>, transform_indices = @transform_5, window_bounds = array<i64: 8, 1>}, {transform_indices = @transform_6, window_bounds = array<i64: 1, 8, 16>}]} {
    %c0_i32 = arith.constant 0 : i32
    %0 = arith.cmpi eq, %arg1, %c0_i32 : i32
    %c0_i32_0 = arith.constant 0 : i32
    %1 = arith.cmpi eq, %arg1, %c0_i32_0 : i32
    %2 = arith.extui %0 : i1 to i32
    %c0_i32_1 = arith.constant 0 : i32
    %3 = arith.cmpi ne, %2, %c0_i32_1 : i32
    scf.if %3 {
      %cst_28 = arith.constant 0.000000e+00 : f32
      %71 = vector.broadcast %cst_28 : f32 to vector<8x128xf32>
      %c0_29 = arith.constant 0 : index
      %c0_30 = arith.constant 0 : index
      %72 = vector.load %arg10[%c0_29, %c0_30] : memref<8x128xf32, #tpu.memory_space<vmem>>, vector<8x128xf32>
      tpu.vector_store %arg10[%c0_29, %c0_30], %71 {strides = array<i32>} : memref<8x128xf32, #tpu.memory_space<vmem>>, vector<8x128xf32>,
    } else {
    }
    %c0 = arith.constant 0 : index
    %c0_2 = arith.constant 0 : index
    %4 = vector.load %arg10[%c0, %c0_2] : memref<8x128xf32, #tpu.memory_space<vmem>>, vector<8x128xf32>
    %c0_3 = arith.constant 0 : index
    %c0_4 = arith.constant 0 : index
    %5 = vector.load %arg9[%c0_3, %c0_4] : memref<8x384xf32, #tpu.memory_space<vmem>>, vector<8x128xf32>
    tpu.vector_store %arg9[%c0_3, %c0_4], %4 {strides = array<i32>} : memref<8x384xf32, #tpu.memory_space<vmem>>, vector<8x128xf32>,
    %c0_5 = arith.constant 0 : index
    %c0_6 = arith.constant 0 : index
    %c0_7 = arith.constant 0 : index
    %6 = vector.load %arg2[%c0_5, %c0_6, %c0_7] : memref<1x8x16xf32, #tpu.memory_space<vmem>>, vector<1x8x16xf32>
    %7 = vector.shape_cast %6 : vector<1x8x16xf32> to vector<8x16xf32>
    %c0_8 = arith.constant 0 : index
    %c128 = arith.constant 128 : index
    %8 = vector.load %arg9[%c0_8, %c128] : memref<8x384xf32, #tpu.memory_space<vmem>>, vector<8x16xf32>
    tpu.vector_store %arg9[%c0_8, %c128], %7 {strides = array<i32>} : memref<8x384xf32, #tpu.memory_space<vmem>>, vector<8x16xf32>,
    %true = arith.constant true
    %9 = arith.xori %1, %true : i1
    %10 = arith.extui %9 : i1 to i32
    %c0_i32_9 = arith.constant 0 : i32
    %11 = arith.cmpi ne, %10, %c0_i32_9 : i32
    scf.if %11 {
      %c0_28 = arith.constant 0 : index
      %c0_29 = arith.constant 0 : index
      %c0_30 = arith.constant 0 : index
      %71 = vector.load %arg3[%c0_28, %c0_29, %c0_30] : memref<1x8x128xf32, #tpu.memory_space<vmem>>, vector<1x8x128xf32>
      %72 = vector.shape_cast %71 : vector<1x8x128xf32> to vector<8x128xf32>
      %c0_31 = arith.constant 0 : index
      %c144 = arith.constant 144 : index
      %73 = vector.load %arg9[%c0_31, %c144] : memref<8x384xf32, #tpu.memory_space<vmem>>, vector<8x128xf32>
      tpu.vector_store %arg9[%c0_31, %c144], %72 {strides = array<i32>} : memref<8x384xf32, #tpu.memory_space<vmem>>, vector<8x128xf32>,
    } else {
    }
    %12 = arith.extui %1 : i1 to i32
    %c0_i32_10 = arith.constant 0 : i32
    %13 = arith.cmpi ne, %12, %c0_i32_10 : i32
    scf.if %13 {
      %cst_28 = arith.constant 0.000000e+00 : f32
      %71 = vector.broadcast %cst_28 : f32 to vector<8x240xf32>
      %c0_29 = arith.constant 0 : index
      %c144 = arith.constant 144 : index
      %72 = vector.load %arg9[%c0_29, %c144] : memref<8x384xf32, #tpu.memory_space<vmem>>, vector<8x240xf32>
      tpu.vector_store %arg9[%c0_29, %c144], %71 {strides = array<i32>} : memref<8x384xf32, #tpu.memory_space<vmem>>, vector<8x240xf32>,
    } else {
    }
    %c0_11 = arith.constant 0 : index
    %c0_12 = arith.constant 0 : index
    %14 = vector.load %arg9[%c0_11, %c0_12] : memref<8x384xf32, #tpu.memory_space<vmem>>, vector<8x384xf32>
    %c0_13 = arith.constant 0 : index
    %c0_14 = arith.constant 0 : index
    %15 = vector.load %arg4[%c0_13, %c0_14] : memref<8x3xf32, #tpu.memory_space<vmem>>, vector<8x3xf32>
    %16 = vector.extract_strided_slice %15 {offsets = [0, 0], sizes = [8, 1], strides = [1, 1]} : vector<8x3xf32> to vector<8x1xf32>
    %c1_i32 = arith.constant 1 : i32
    %17 = tpu.dynamic_rotate %14 by %c1_i32 dim 1 : vector<8x384xf32>, i32 -> vector<8x384xf32>
    %18 = vector.broadcast %16 : vector<8x1xf32> to vector<8x384xf32>
    %19 = arith.mulf %18, %17 : vector<8x384xf32>
    %20 = vector.extract_strided_slice %15 {offsets = [0, 1], sizes = [8, 1], strides = [1, 1]} : vector<8x3xf32> to vector<8x1xf32>
    %21 = vector.broadcast %20 : vector<8x1xf32> to vector<8x384xf32>
    %22 = arith.mulf %21, %14 : vector<8x384xf32>
    %23 = arith.addf %19, %22 : vector<8x384xf32>
    %24 = vector.extract_strided_slice %15 {offsets = [0, 2], sizes = [8, 1], strides = [1, 1]} : vector<8x3xf32> to vector<8x1xf32>
    %c383_i32 = arith.constant 383 : i32
    %25 = tpu.dynamic_rotate %14 by %c383_i32 dim 1 : vector<8x384xf32>, i32 -> vector<8x384xf32>
    %26 = vector.broadcast %24 : vector<8x1xf32> to vector<8x384xf32>
    %27 = arith.mulf %26, %25 : vector<8x384xf32>
    %28 = arith.addf %23, %27 : vector<8x384xf32>
    %29 = tpu.iota {dimensions = array<i32: 1>} : vector<1x384xi32>
    %c16_i32 = arith.constant 16 : i32
    %30 = arith.muli %arg1, %c16_i32 : i32
    %c128_i32 = arith.constant 128 : i32
    %31 = arith.subi %30, %c128_i32 : i32
    %32 = vector.broadcast %31 : i32 to vector<1x384xi32>
    %33 = arith.addi %29, %32 : vector<1x384xi32>
    %c0_i32_15 = arith.constant 0 : i32
    %34 = vector.broadcast %c0_i32_15 : i32 to vector<1x384xi32>
    %35 = arith.cmpi sge, %33, %34 : vector<1x384xi32>
    %c16_i32_16 = arith.constant 16 : i32
    %36 = vector.broadcast %c16_i32_16 : i32 to vector<1x384xi32>
    %37 = arith.cmpi slt, %33, %36 : vector<1x384xi32>
    %38 = arith.andi %35, %37 : vector<1x384xi1>
    %39 = arith.ori %0, %1 : i1
    %true_17 = arith.constant true
    %40 = arith.xori %39, %true_17 : i1
    %41 = vector.broadcast %40 : i1 to vector<1x384xi1>
    %42 = arith.ori %38, %41 : vector<1x384xi1>
    %cst = arith.constant 0.000000e+00 : f32
    %43 = vector.shape_cast %42 : vector<1x384xi1> to vector<1x384xi1>
    %44 = vector.broadcast %43 : vector<1x384xi1> to vector<8x384xi1>
    %45 = vector.broadcast %cst : f32 to vector<8x384xf32>
    %46 = arith.select %44, %28, %45 : vector<8x384xi1>, vector<8x384xf32>
    %c0_18 = arith.constant 0 : index
    %c0_19 = arith.constant 0 : index
    %47 = vector.load %arg5[%c0_18, %c0_19] : memref<8x3xf32, #tpu.memory_space<vmem>>, vector<8x3xf32>
    %48 = vector.extract_strided_slice %47 {offsets = [0, 0], sizes = [8, 1], strides = [1, 1]} : vector<8x3xf32> to vector<8x1xf32>
    %c3_i32 = arith.constant 3 : i32
    %49 = tpu.dynamic_rotate %46 by %c3_i32 dim 1 : vector<8x384xf32>, i32 -> vector<8x384xf32>
    %50 = vector.broadcast %48 : vector<8x1xf32> to vector<8x384xf32>
    %51 = arith.mulf %50, %49 : vector<8x384xf32>
    %52 = vector.extract_strided_slice %47 {offsets = [0, 1], sizes = [8, 1], strides = [1, 1]} : vector<8x3xf32> to vector<8x1xf32>
    %53 = vector.broadcast %52 : vector<8x1xf32> to vector<8x384xf32>
    %54 = arith.mulf %53, %46 : vector<8x384xf32>
    %55 = arith.addf %51, %54 : vector<8x384xf32>
    %56 = vector.extract_strided_slice %47 {offsets = [0, 2], sizes = [8, 1], strides = [1, 1]} : vector<8x3xf32> to vector<8x1xf32>
    %c381_i32 = arith.constant 381 : i32
    %57 = tpu.dynamic_rotate %46 by %c381_i32 dim 1 : vector<8x384xf32>, i32 -> vector<8x384xf32>
    %58 = vector.broadcast %56 : vector<8x1xf32> to vector<8x384xf32>
    %59 = arith.mulf %58, %57 : vector<8x384xf32>
    %60 = arith.addf %55, %59 : vector<8x384xf32>
    %61 = vector.extract_strided_slice %60 {offsets = [0, 128], sizes = [8, 16], strides = [1, 1]} : vector<8x384xf32> to vector<8x16xf32>
    %c0_20 = arith.constant 0 : index
    %c0_21 = arith.constant 0 : index
    %62 = vector.load %arg6[%c0_20, %c0_21] : memref<8x8xf32, #tpu.memory_space<vmem>>, vector<8x8xf32>
    %cst_22 = arith.constant dense<0.000000e+00> : vector<8x16xf32>
    %63 = tpu.matmul %62, %61, %cst_22 {dimension_numbers = #tpu.dot_dimension_numbers<[1], [0], [0], [1], [0, 0, 1, 1], [], []>} : vector<8x8xf32>, vector<8x16xf32>, vector<8x16xf32> -> vector<8x16xf32>
    %c0_23 = arith.constant 0 : index
    %c0_24 = arith.constant 0 : index
    %64 = vector.load %arg7[%c0_23, %c0_24] : memref<8x1xf32, #tpu.memory_space<vmem>>, vector<8x1xf32>
    %65 = vector.broadcast %64 : vector<8x1xf32> to vector<8x16xf32>
    %66 = arith.addf %63, %65 : vector<8x16xf32>
    %67 = arith.mulf %7, %66 : vector<8x16xf32>
    %c0_25 = arith.constant 0 : index
    %c0_26 = arith.constant 0 : index
    %c0_27 = arith.constant 0 : index
    %68 = vector.load %arg8[%c0_25, %c0_26, %c0_27] : memref<1x8x16xf32, #tpu.memory_space<vmem>>, vector<1x8x16xf32>
    %69 = vector.shape_cast %68 : vector<1x8x16xf32> to vector<8x16xf32>
    %70 = vector.shape_cast %67 : vector<8x16xf32> to vector<1x8x16xf32>
    tpu.vector_store %arg8[%c0_25, %c0_26, %c0_27], %70 {strides = array<i32>} : memref<1x8x16xf32, #tpu.memory_space<vmem>>, vector<1x8x16xf32>,
    return
  }
  func.func @transform_0(%arg0: i32, %arg1: i32) -> (i32, i32, i32) {
    %c0_i32 = arith.constant 0 : i32
    %c0_i32_0 = arith.constant 0 : i32
    return %arg0, %c0_i32, %arg1 : i32, i32, i32
  }
  func.func @transform_1(%arg0: i32, %arg1: i32) -> (i32, i32, i32) {
    %c0_i32 = arith.constant 0 : i32
    %c0_i32_0 = arith.constant 0 : i32
    %c0_i32_1 = arith.constant 0 : i32
    %c0_i32_2 = arith.constant 0 : i32
    return %c0_i32, %c0_i32_0, %c0_i32_1 : i32, i32, i32
  }
  func.func @transform_2(%arg0: i32, %arg1: i32) -> (i32, i32) {
    %c0_i32 = arith.constant 0 : i32
    %c0_i32_0 = arith.constant 0 : i32
    %c0_i32_1 = arith.constant 0 : i32
    return %c0_i32, %c0_i32_0 : i32, i32
  }
  func.func @transform_3(%arg0: i32, %arg1: i32) -> (i32, i32) {
    %c0_i32 = arith.constant 0 : i32
    %c0_i32_0 = arith.constant 0 : i32
    %c0_i32_1 = arith.constant 0 : i32
    return %c0_i32, %c0_i32_0 : i32, i32
  }
  func.func @transform_4(%arg0: i32, %arg1: i32) -> (i32, i32) {
    %c0_i32 = arith.constant 0 : i32
    %c0_i32_0 = arith.constant 0 : i32
    %c0_i32_1 = arith.constant 0 : i32
    return %c0_i32, %c0_i32_0 : i32, i32
  }
  func.func @transform_5(%arg0: i32, %arg1: i32) -> (i32, i32) {
    %c0_i32 = arith.constant 0 : i32
    %c0_i32_0 = arith.constant 0 : i32
    %c0_i32_1 = arith.constant 0 : i32
    return %c0_i32, %c0_i32_0 : i32, i32
  }
  func.func @transform_6(%arg0: i32, %arg1: i32) -> (i32, i32, i32) {
    %c0_i32 = arith.constant 0 : i32
    %c0_i32_0 = arith.constant 0 : i32
    return %arg0, %c0_i32, %arg1 : i32, i32, i32
  }
}

module attributes {stable_mosaic.version = 11 : i64} {
  func.func @kernel(%arg0: i32, %arg1: i32, %arg2: memref<1x8x16xf32, #tpu.memory_space<vmem>>, %arg3: memref<1x8x128xf32, #tpu.memory_space<vmem>>, %arg4: memref<8x3xf32, #tpu.memory_space<vmem>>, %arg5: memref<8x3xf32, #tpu.memory_space<vmem>>, %arg6: memref<8x8xf32, #tpu.memory_space<vmem>>, %arg7: memref<8x1xf32, #tpu.memory_space<vmem>>, %arg8: memref<1x8x16xf32, #tpu.memory_space<vmem>>, %arg9: memref<8x384xf32, #tpu.memory_space<vmem>>, %arg10: memref<8x128xf32, #tpu.memory_space<vmem>>) attributes {dimension_semantics = [#tpu.dimension_semantics<parallel>, #tpu.dimension_semantics<arbitrary>], iteration_bounds = array<i64: 2, 1>, scalar_prefetch = 0 : i64, scratch_operands = 2 : i64, tpu.core_type = #tpu.core_type<tc>, window_params = [{transform_indices = @transform_0, window_bounds = array<i64: 1, 8, 16>}, {pipeline_mode = #tpu.pipeline_mode<synchronous>, transform_indices = @transform_1, window_bounds = array<i64: 1, 8, 128>}, {pipeline_mode = #tpu.pipeline_mode<synchronous>, transform_indices = @transform_2, window_bounds = array<i64: 8, 3>}, {pipeline_mode = #tpu.pipeline_mode<synchronous>, transform_indices = @transform_3, window_bounds = array<i64: 8, 3>}, {pipeline_mode = #tpu.pipeline_mode<synchronous>, transform_indices = @transform_4, window_bounds = array<i64: 8, 8>}, {pipeline_mode = #tpu.pipeline_mode<synchronous>, transform_indices = @transform_5, window_bounds = array<i64: 8, 1>}, {transform_indices = @transform_6, window_bounds = array<i64: 1, 8, 16>}]} {
    %c0_i32 = arith.constant 0 : i32
    %0 = arith.cmpi eq, %arg1, %c0_i32 : i32
    %c0_i32_0 = arith.constant 0 : i32
    %1 = arith.cmpi eq, %arg1, %c0_i32_0 : i32
    %2 = arith.extui %0 : i1 to i32
    %c0_i32_1 = arith.constant 0 : i32
    %3 = arith.cmpi ne, %2, %c0_i32_1 : i32
    scf.if %3 {
      %cst_28 = arith.constant 0.000000e+00 : f32
      %71 = vector.broadcast %cst_28 : f32 to vector<8x128xf32>
      %c0_29 = arith.constant 0 : index
      %c0_30 = arith.constant 0 : index
      %72 = vector.load %arg10[%c0_29, %c0_30] : memref<8x128xf32, #tpu.memory_space<vmem>>, vector<8x128xf32>
      tpu.vector_store %arg10[%c0_29, %c0_30], %71 {strides = array<i32>} : memref<8x128xf32, #tpu.memory_space<vmem>>, vector<8x128xf32>,
    } else {
    }
    %c0 = arith.constant 0 : index
    %c0_2 = arith.constant 0 : index
    %4 = vector.load %arg10[%c0, %c0_2] : memref<8x128xf32, #tpu.memory_space<vmem>>, vector<8x128xf32>
    %c0_3 = arith.constant 0 : index
    %c0_4 = arith.constant 0 : index
    %5 = vector.load %arg9[%c0_3, %c0_4] : memref<8x384xf32, #tpu.memory_space<vmem>>, vector<8x128xf32>
    tpu.vector_store %arg9[%c0_3, %c0_4], %4 {strides = array<i32>} : memref<8x384xf32, #tpu.memory_space<vmem>>, vector<8x128xf32>,
    %c0_5 = arith.constant 0 : index
    %c0_6 = arith.constant 0 : index
    %c0_7 = arith.constant 0 : index
    %6 = vector.load %arg2[%c0_5, %c0_6, %c0_7] : memref<1x8x16xf32, #tpu.memory_space<vmem>>, vector<1x8x16xf32>
    %7 = vector.shape_cast %6 : vector<1x8x16xf32> to vector<8x16xf32>
    %c0_8 = arith.constant 0 : index
    %c128 = arith.constant 128 : index
    %8 = vector.load %arg9[%c0_8, %c128] : memref<8x384xf32, #tpu.memory_space<vmem>>, vector<8x16xf32>
    tpu.vector_store %arg9[%c0_8, %c128], %7 {strides = array<i32>} : memref<8x384xf32, #tpu.memory_space<vmem>>, vector<8x16xf32>,
    %true = arith.constant true
    %9 = arith.xori %1, %true : i1
    %10 = arith.extui %9 : i1 to i32
    %c0_i32_9 = arith.constant 0 : i32
    %11 = arith.cmpi ne, %10, %c0_i32_9 : i32
    scf.if %11 {
      %c0_28 = arith.constant 0 : index
      %c0_29 = arith.constant 0 : index
      %c0_30 = arith.constant 0 : index
      %71 = vector.load %arg3[%c0_28, %c0_29, %c0_30] : memref<1x8x128xf32, #tpu.memory_space<vmem>>, vector<1x8x128xf32>
      %72 = vector.shape_cast %71 : vector<1x8x128xf32> to vector<8x128xf32>
      %c0_31 = arith.constant 0 : index
      %c144 = arith.constant 144 : index
      %73 = vector.load %arg9[%c0_31, %c144] : memref<8x384xf32, #tpu.memory_space<vmem>>, vector<8x128xf32>
      tpu.vector_store %arg9[%c0_31, %c144], %72 {strides = array<i32>} : memref<8x384xf32, #tpu.memory_space<vmem>>, vector<8x128xf32>,
    } else {
    }
    %12 = arith.extui %1 : i1 to i32
    %c0_i32_10 = arith.constant 0 : i32
    %13 = arith.cmpi ne, %12, %c0_i32_10 : i32
    scf.if %13 {
      %cst_28 = arith.constant 0.000000e+00 : f32
      %71 = vector.broadcast %cst_28 : f32 to vector<8x240xf32>
      %c0_29 = arith.constant 0 : index
      %c144 = arith.constant 144 : index
      %72 = vector.load %arg9[%c0_29, %c144] : memref<8x384xf32, #tpu.memory_space<vmem>>, vector<8x240xf32>
      tpu.vector_store %arg9[%c0_29, %c144], %71 {strides = array<i32>} : memref<8x384xf32, #tpu.memory_space<vmem>>, vector<8x240xf32>,
    } else {
    }
    %c0_11 = arith.constant 0 : index
    %c0_12 = arith.constant 0 : index
    %14 = vector.load %arg9[%c0_11, %c0_12] : memref<8x384xf32, #tpu.memory_space<vmem>>, vector<8x384xf32>
    %c0_13 = arith.constant 0 : index
    %c0_14 = arith.constant 0 : index
    %15 = vector.load %arg4[%c0_13, %c0_14] : memref<8x3xf32, #tpu.memory_space<vmem>>, vector<8x3xf32>
    %16 = vector.extract_strided_slice %15 {offsets = [0, 0], sizes = [8, 1], strides = [1, 1]} : vector<8x3xf32> to vector<8x1xf32>
    %c1_i32 = arith.constant 1 : i32
    %17 = tpu.dynamic_rotate %14 by %c1_i32 dim 1 : vector<8x384xf32>, i32 -> vector<8x384xf32>
    %18 = vector.broadcast %16 : vector<8x1xf32> to vector<8x384xf32>
    %19 = arith.mulf %18, %17 : vector<8x384xf32>
    %20 = vector.extract_strided_slice %15 {offsets = [0, 1], sizes = [8, 1], strides = [1, 1]} : vector<8x3xf32> to vector<8x1xf32>
    %21 = vector.broadcast %20 : vector<8x1xf32> to vector<8x384xf32>
    %22 = arith.mulf %21, %14 : vector<8x384xf32>
    %23 = arith.addf %19, %22 : vector<8x384xf32>
    %24 = vector.extract_strided_slice %15 {offsets = [0, 2], sizes = [8, 1], strides = [1, 1]} : vector<8x3xf32> to vector<8x1xf32>
    %c383_i32 = arith.constant 383 : i32
    %25 = tpu.dynamic_rotate %14 by %c383_i32 dim 1 : vector<8x384xf32>, i32 -> vector<8x384xf32>
    %26 = vector.broadcast %24 : vector<8x1xf32> to vector<8x384xf32>
    %27 = arith.mulf %26, %25 : vector<8x384xf32>
    %28 = arith.addf %23, %27 : vector<8x384xf32>
    %29 = tpu.iota {dimensions = array<i32: 1>} : vector<1x384xi32>
    %c16_i32 = arith.constant 16 : i32
    %30 = arith.muli %arg1, %c16_i32 : i32
    %c128_i32 = arith.constant 128 : i32
    %31 = arith.subi %30, %c128_i32 : i32
    %32 = vector.broadcast %31 : i32 to vector<1x384xi32>
    %33 = arith.addi %29, %32 : vector<1x384xi32>
    %c0_i32_15 = arith.constant 0 : i32
    %34 = vector.broadcast %c0_i32_15 : i32 to vector<1x384xi32>
    %35 = arith.cmpi sge, %33, %34 : vector<1x384xi32>
    %c16_i32_16 = arith.constant 16 : i32
    %36 = vector.broadcast %c16_i32_16 : i32 to vector<1x384xi32>
    %37 = arith.cmpi slt, %33, %36 : vector<1x384xi32>
    %38 = arith.andi %35, %37 : vector<1x384xi1>
    %39 = arith.ori %0, %1 : i1
    %true_17 = arith.constant true
    %40 = arith.xori %39, %true_17 : i1
    %41 = vector.broadcast %40 : i1 to vector<1x384xi1>
    %42 = arith.ori %38, %41 : vector<1x384xi1>
    %cst = arith.constant 0.000000e+00 : f32
    %43 = vector.shape_cast %42 : vector<1x384xi1> to vector<1x384xi1>
    %44 = vector.broadcast %43 : vector<1x384xi1> to vector<8x384xi1>
    %45 = vector.broadcast %cst : f32 to vector<8x384xf32>
    %46 = arith.select %44, %28, %45 : vector<8x384xi1>, vector<8x384xf32>
    %c0_18 = arith.constant 0 : index
    %c0_19 = arith.constant 0 : index
    %47 = vector.load %arg5[%c0_18, %c0_19] : memref<8x3xf32, #tpu.memory_space<vmem>>, vector<8x3xf32>
    %48 = vector.extract_strided_slice %47 {offsets = [0, 0], sizes = [8, 1], strides = [1, 1]} : vector<8x3xf32> to vector<8x1xf32>
    %c3_i32 = arith.constant 3 : i32
    %49 = tpu.dynamic_rotate %46 by %c3_i32 dim 1 : vector<8x384xf32>, i32 -> vector<8x384xf32>
    %50 = vector.broadcast %48 : vector<8x1xf32> to vector<8x384xf32>
    %51 = arith.mulf %50, %49 : vector<8x384xf32>
    %52 = vector.extract_strided_slice %47 {offsets = [0, 1], sizes = [8, 1], strides = [1, 1]} : vector<8x3xf32> to vector<8x1xf32>
    %53 = vector.broadcast %52 : vector<8x1xf32> to vector<8x384xf32>
    %54 = arith.mulf %53, %46 : vector<8x384xf32>
    %55 = arith.addf %51, %54 : vector<8x384xf32>
    %56 = vector.extract_strided_slice %47 {offsets = [0, 2], sizes = [8, 1], strides = [1, 1]} : vector<8x3xf32> to vector<8x1xf32>
    %c381_i32 = arith.constant 381 : i32
    %57 = tpu.dynamic_rotate %46 by %c381_i32 dim 1 : vector<8x384xf32>, i32 -> vector<8x384xf32>
    %58 = vector.broadcast %56 : vector<8x1xf32> to vector<8x384xf32>
    %59 = arith.mulf %58, %57 : vector<8x384xf32>
    %60 = arith.addf %55, %59 : vector<8x384xf32>
    %61 = vector.extract_strided_slice %60 {offsets = [0, 128], sizes = [8, 16], strides = [1, 1]} : vector<8x384xf32> to vector<8x16xf32>
    %c0_20 = arith.constant 0 : index
    %c0_21 = arith.constant 0 : index
    %62 = vector.load %arg6[%c0_20, %c0_21] : memref<8x8xf32, #tpu.memory_space<vmem>>, vector<8x8xf32>
    %cst_22 = arith.constant dense<0.000000e+00> : vector<8x16xf32>
    %63 = tpu.matmul %62, %61, %cst_22 {dimension_numbers = #tpu.dot_dimension_numbers<[1], [0], [0], [1], [0, 0, 1, 1], [], []>} : vector<8x8xf32>, vector<8x16xf32>, vector<8x16xf32> -> vector<8x16xf32>
    %c0_23 = arith.constant 0 : index
    %c0_24 = arith.constant 0 : index
    %64 = vector.load %arg7[%c0_23, %c0_24] : memref<8x1xf32, #tpu.memory_space<vmem>>, vector<8x1xf32>
    %65 = vector.broadcast %64 : vector<8x1xf32> to vector<8x16xf32>
    %66 = arith.addf %63, %65 : vector<8x16xf32>
    %67 = arith.mulf %7, %66 : vector<8x16xf32>
    %c0_25 = arith.constant 0 : index
    %c0_26 = arith.constant 0 : index
    %c0_27 = arith.constant 0 : index
    %68 = vector.load %arg8[%c0_25, %c0_26, %c0_27] : memref<1x8x16xf32, #tpu.memory_space<vmem>>, vector<1x8x16xf32>
    %69 = vector.shape_cast %68 : vector<1x8x16xf32> to vector<8x16xf32>
    %70 = vector.shape_cast %67 : vector<8x16xf32> to vector<1x8x16xf32>
    tpu.vector_store %arg8[%c0_25, %c0_26, %c0_27], %70 {strides = array<i32>} : memref<1x8x16xf32, #tpu.memory_space<vmem>>, vector<1x8x16xf32>,
    return
  }
  func.func @transform_0(%arg0: i32, %arg1: i32) -> (i32, i32, i32) {
    %c0_i32 = arith.constant 0 : i32
    %c0_i32_0 = arith.constant 0 : i32
    return %arg0, %c0_i32, %arg1 : i32, i32, i32
  }
  func.func @transform_1(%arg0: i32, %arg1: i32) -> (i32, i32, i32) {
    %c0_i32 = arith.constant 0 : i32
    %c0_i32_0 = arith.constant 0 : i32
    %c0_i32_1 = arith.constant 0 : i32
    %c0_i32_2 = arith.constant 0 : i32
    return %c0_i32, %c0_i32_0, %c0_i32_1 : i32, i32, i32
  }
  func.func @transform_2(%arg0: i32, %arg1: i32) -> (i32, i32) {
    %c0_i32 = arith.constant 0 : i32
    %c0_i32_0 = arith.constant 0 : i32
    %c0_i32_1 = arith.constant 0 : i32
    return %c0_i32, %c0_i32_0 : i32, i32
  }
  func.func @transform_3(%arg0: i32, %arg1: i32) -> (i32, i32) {
    %c0_i32 = arith.constant 0 : i32
    %c0_i32_0 = arith.constant 0 : i32
    %c0_i32_1 = arith.constant 0 : i32
    return %c0_i32, %c0_i32_0 : i32, i32
  }
  func.func @transform_4(%arg0: i32, %arg1: i32) -> (i32, i32) {
    %c0_i32 = arith.constant 0 : i32
    %c0_i32_0 = arith.constant 0 : i32
    %c0_i32_1 = arith.constant 0 : i32
    return %c0_i32, %c0_i32_0 : i32, i32
  }
  func.func @transform_5(%arg0: i32, %arg1: i32) -> (i32, i32) {
    %c0_i32 = arith.constant 0 : i32
    %c0_i32_0 = arith.constant 0 : i32
    %c0_i32_1 = arith.constant 0 : i32
    return %c0_i32, %c0_i32_0 : i32, i32
  }
  func.func @transform_6(%arg0: i32, %arg1: i32) -> (i32, i32, i32) {
    %c0_i32 = arith.constant 0 : i32
    %c0_i32_0 = arith.constant 0 : i32
    return %arg0, %c0_i32, %arg1 : i32, i32, i32
  }
}

</mosaic_0001>

<bundles_post_ra>
// kernel: tpu_custom_call.1
= control target key start
LH: loop header
LB: loop body
LE: loop exit
PB: predicated region body
PF: predicated region fallthrough
CT: control target
= control target key end

     0   :  { %11 = vsyncpa [#allocation5], 0  ;;  %s917_s0 = inlined_call_operand.vmem [shape: f32[2,8,16], index: 0, kind: input, shape index: {}]   ;;  %s918_s1 = inlined_call_operand.vmem [shape: f32[1,8,128], index: 1, kind: input, shape index: {}]   ;;  %s919_s2 = inlined_call_operand.vmem [shape: f32[8,3], index: 2, kind: input, shape index: {}]   ;;  %s920_s3 = inlined_call_operand.vmem [shape: f32[8,3], index: 3, kind: input, shape index: {}]   ;;  %s921_s4 = inlined_call_operand.vmem [shape: f32[8,8], index: 4, kind: input, shape index: {}]   ;;  %s922_s5 = inlined_call_operand.vmem [shape: f32[8,1], index: 5, kind: input, shape index: {}]   ;;  %s923_s6 = inlined_call_operand.hbm [shape: f32[2,8,16], index: 6, kind: output, shape index: {}]  }
   0x1   :  { %13 = vsyncpa [#allocation5 + $0x1], 0  ;;  %s798_s21 = smov 0   ;;  %s800_s1 = smov 0  }
   0x2   :  { %s802_s22 = smov 0   ;;  %s804_s23 = smov 0  }
   0x3   :  { %s806_s24 = smov 0   ;;  %s808_s25 = smov 0  }
   0x4 LB: > { %s586_s26 = sadd.s32 4294967295, %s751_s25   ;;  %s587_s27 = sadd.s32 4294967294, %s751_s25   ;;  %s751_s25 = sphi %s808_s25, %s19_s25   ;;  %s747_s24 = sphi %s806_s24, %s930_s24   ;;  %s743_s23 = sphi %s804_s23, %s929_s23   ;;  %s739_s22 = sphi %s802_s22, %s928_s22   ;;  %s735_s1 = sphi %s800_s1, %s927_s1   ;;  %s731_s21 = sphi %s798_s21, %s926_s21  }
   0x5   : > { %s31_s28 = sadd.s32 1, %s747_s24  ;;  %s173_s29 = sadd.s32 1, %s739_s22 }
   0x6   : > { %p33_p0 = scmp.ge.s32.totalorder %s31_s28, 2  ;;  %p183_p1 = scmp.ne.s32.totalorder %s739_s22, %s735_s1 }
   0x7   : > { %p184_p2 = scmp.eq.s32.totalorder %s586_s26, 1  ;;  %p189_p3 = scmp.ne.s32.totalorder %s735_s1, %s731_s21 }
   0x8   : > { %s932_s28 = smov (%p33_p0, %s31_s28), 0  ;;  %p190_p5 = scmp.eq.s32.totalorder %s587_s27, 1 }
   0x9   : > { %p838_p4 = por %p184_p2, %p183_p1  ;;  %s168_s7 = ssub.s32 %s747_s24, %s932_s28 }
   0xa   : > { %p590_p6 = scmp.ge.s32.totalorder %s751_s25, 1  ;;  %p171_p7 = scmp.eq.s32.totalorder %s168_s7, 0 }
   0xb   : > { %p845_p8 = por %p190_p5, %p189_p3  ;;  %p233_p9 = scmp.lt.s32.totalorder %s751_s25, 3 }
   0xc   : > { %s851_s9 = scalar_select %p171_p7, %s739_s22, %s173_s29  }
   0xd   : > { %p234_p10 = pnand %p590_p6, %p233_p9 }
   0xe   : > { %p265_p11 = scmp.lt.s32.totalorder (!%p234_p10), %s743_s23, 1  ;;  %s757_s14 = smov (!%p234_p10), 1  }
   0xf   : > { %237 = sbr.rel (%p234_p10) target bundleno = 499 (0x1f3), region = 44  ;;  %s758_s18 = smov (!%p234_p10), 127  }
  0x10   : > { %s759_s26 = smov (!%p234_p10), 3   ;;  %s761_s27 = smov (!%p234_p10), 125  }
  0x14   : > { %v303_v0 = vld [vmem:[%s919_s2] sm:$0xff]  ;;  %v753_v1 = vmov 2   ;;  %v754_v2 = vmov 0   ;;  %s266_s12 = scalar_select %p265_p11, %s743_s23, 1  ;;  %v755_v3 = vmov 0.0   ;;  %vm280_vm0 = vcmask 130048  }
  0x15   : > { %671 = vset.pattern.permute.xlu1 %v753_v1  ;;  %669 = vset.pattern.permute.xlu0 %v754_v2  ;;  %v756_v4 = vmov 1   ;;  %vm297_vm1 = vcmask 1047680   ;;  %v386_v7 = vld [vmem:[%s920_s3] sm:$0xff]  ;;  %v310_v8 = vlaneseq  ;;  %vm760_vm5 = vmmov 0  }
  0x16   : > { %345 = vperm.xlu1 %671, %v303_v0   ;;  %318 = vperm.xlu0 %669, %v303_v0   ;;  %s592_s13 = sshll.u32 %s266_s12, 3  ;;  %v418_v27 = vld [vmem:[%s922_s5] sm:$0xff]  ;;  %vm424_vm8 = vcmask 64512   ;;  %s262_s12 = sand.u32 1, %s735_s1  }
  0x17   : > { %600 = vmatprep.subr.mxu0 %v755_v3  ;;  %s271_s17 = scalar_lea.vmem %s917_s0, %s592_s13  ;;  %v311_v11 = vand.u32 127, %v310_v8  ;;  %602 = vmatprep.mubr.msk.f32.mxu0 %vm760_vm5, %v755_v3  ;;  %v417_v42 = vld [vmem:[%s921_s4] sm:$0xff]  ;;  %s591_s13 = sshll.u32 %s262_s12, 3 }
  0x18   : > { %v861_v5 = vld [vmem:[%s271_s17] sm:$0xff]  ;;  %s264_s15 = scalar_lea.vmem [#allocation4], %s591_s13  ;;  %s501_s20 = scalar_lea.sflag [#allocation5], %s262_s12 }
  0x19   : > { %281 = vst.msk [vmem:[#allocation2 + $0x8] sm:$0xff] %vm280_vm0, %v861_v5  ;;  %vm312_vm2 = vcmp.lt.s32.totalorder %v311_v11, 1  ;;  %v354_v14 = vadd.s32 128, %v311_v11  ;;  %vm340_vm3 = vcmp.lt.s32.totalorder %v311_v11, 127  ;;  %vm391_vm6 = vcmp.lt.s32.totalorder %v311_v11, 3  ;;  %s515_s16 = sshll.u32 %s264_s15, 4  ;;  %s516_s16 = int_to_ptr.vmem [resolvable:$true] %s515_s16 }
  0x1a   : > { %670 = vset.pattern.permute.xlu0 %v756_v4  ;;  %304 = vrot.lane.b32.xlu1 %v755_v3, %s757_s14  ;;  %298 = vst.msk [vmem:[#allocation2 + $0x8] sm:$0xff] %vm297_vm1, %v755_v3  ;;  %vm409_vm7 = vcmp.lt.s32.totalorder %v311_v11, 125 }
  0x1b   : > { %325 = vperm.xlu0 %670, %v303_v0   ;;  %673 = vset.pattern.permute.xlu1 %v756_v4  ;;  %v360_v20 = vadd.s32 4294967168, %v354_v14 }
  0x1d   : > { %vm366_vm4 = vcmp.lt.s32.totalorder %v360_v20, 16 }
  0x1f   : > { %672 = vset.pattern.permute.xlu0 %v754_v2 }
  0x21   : > { %v301_v6 = vld [vmem:[#allocation2 + $0x8] sm:$0xff] }
  0x22   : > { %306 = vrot.lane.b32.xlu1 %v301_v6, %s757_s14  ;;  %336 = vrot.lane.b32.xlu0 %v301_v6, %s758_s18  ;;  %s595_s14 = sshll.u32 %s743_s23, 7  ;;  %s762_s23 = smov [#allocation4]  }
  0x23   : > { %s513_s19 = scalar_lea.hbm %s923_s6, %s595_s14 }
  0x26   : > { %338 = vrot.lane.b32.xlu1 %v755_v3, %s758_s18  ;;  %395 = vperm.xlu0 %672, %v386_v7  }
  0x2a   : > { %400 = vperm.xlu1 %673, %v386_v7   ;;  %387 = vrot.lane.b32.xlu0 %v755_v3, %s759_s26 }
  0x2e   : > { %674 = vset.pattern.permute.xlu1 %v753_v1 }
  0x2f   : > { %412 = vperm.xlu1 %674, %v386_v7  }
  0x91   : > { %v346_v9 = vpop.permute.xlu1 %345  ;;  %v319_v10 = vpop.permute.xlu0 %318 }
  0x95   : > { %v305_v12 = vpop.permute.xlu1 %304 }
  0x96   : > { %v326_v13 = vpop.permute.xlu0 %325 }
  0x97   : > { %v329_v17 = vmul.f32 %v326_v13, %v301_v6 }
  0x99   : > { %v307_v15 = vpop.permute.xlu1 %306 }
  0x9a   : > { %v314_v16 = vsel %vm312_vm2, %v305_v12, %v307_v15  ;;  %v337_v19 = vpop.permute.xlu0 %336 }
  0x9b   : > { %v322_v18 = vmul.f32 %v319_v10, %v314_v16 }
  0x9d   : > { %v339_v21 = vpop.permute.xlu1 %338  ;;  %v332_v23 = vadd.f32 %v329_v17, %v322_v18 }
  0x9e   : > { %v341_v22 = vsel %vm340_vm3, %v337_v19, %v339_v21 }
  0x9f   : > { %v349_v24 = vmul.f32 %v346_v9, %v341_v22 }
  0xa1   : > { %v352_v25 = vadd.f32 %v349_v24, %v332_v23  ;;  %v396_v29 = vpop.permute.xlu0 %395 }
  0xa3   : > { %v384_v26 = vsel %vm366_vm4, %v352_v25, 0.0 }
  0xa4   : > { %405 = vrot.lane.b32.xlu0 %v384_v26, %s761_s27  ;;  %389 = vrot.lane.b32.xlu1 %v384_v26, %s759_s26  ;;  %s675_s26 = scalar_lea.vmem %s516_s16, 128 }
  0xa5   : > { %v401_v28 = vpop.permute.xlu1 %400  ;;  %v388_v31 = vpop.permute.xlu0 %387  ;;  %p676_p12 = scmp.ne.s32.totalorder %s516_s16, %s675_s26 }
  0xa6   : > { %v403_v35 = vmul.f32 %v401_v28, %v384_v26 }
  0xa7   : > { %p677_p13 = pnand %p676_p12, %p838_p4 }
  0xa8   : > { %421 = vperm.xlu0 %672, %v418_v27   ;;  %407 = vrot.lane.b32.xlu1 %v755_v3, %s761_s27  ;;  %s679_s27 = sshll.u32 %s762_s23, 4  ;;  %s680_s27 = int_to_ptr.vmem [resolvable:$false] %s679_s27 }
  0xa9   : > { %p678_p0 = pneg %p677_p13  ;;  %s681_s29 = scalar_lea.vmem %s680_s27, 256 }
  0xaa   : > { %v413_v30 = vpop.permute.xlu1 %412  ;;  %p682_p1 = scmp.lt.s32.totalorder %s516_s16, %s680_s27  ;;  %p683_p2 = scmp.lt.s32.totalorder %s681_s29, %s675_s26 }
  0xac   : > { %p684_p3 = por %p683_p2, %p682_p1 }
  0xae   : > { %p685_p5 = pnand %p684_p3, %p678_p0 }
 0x116   : > { %v390_v32 = vpop.permute.xlu1 %389  ;;  %v406_v36 = vpop.permute.xlu0 %405 }
 0x117   : > { %v392_v33 = vsel %vm391_vm6, %v388_v31, %v390_v32 }
 0x118   : > { %v398_v34 = vmul.f32 %v396_v29, %v392_v33 }
 0x11a   : > { %v408_v37 = vpop.permute.xlu1 %407  ;;  %v404_v40 = vadd.f32 %v403_v35, %v398_v34 }
 0x11b   : > { %v410_v38 = vsel %vm409_vm7, %v406_v36, %v408_v37 }
 0x11c   : > { %v415_v39 = vmul.f32 %v413_v30, %v410_v38 }
 0x11e   : > { %v416_v41 = vadd.f32 %v415_v39, %v404_v40 }
 0x120   : > { %601 = vmatpush3.msra.mxu0 %v416_v41 }
 0x121   : > { %603 = vmatmul.mubr.msk.f32.vlgmr.msra.gmra.mxu0 %vm424_vm8, %v417_v42 }
 0x123   : > { %v422_v43 = vpop.permute.xlu0 %421 }
 0x1e1   : > { %v494_v44 = vpop.f32.mrf.mxu0 }
 0x1e2   : > { %v495_v45 = vadd.f32 %v494_v44, %v422_v43 }
 0x1e3   : > { %v604_v46 = vpop.f32.mrf.mxu0 }
 0x1e4   : > { %v498_v47 = vmul.f32 %v495_v45, %v861_v5 }
 0x1e6   : > { %499 = vst.msk [vmem:[%s264_s15] sm:$0xff] %vm280_vm0, %v498_v47 }
 0x1e7   : > { %688 = shalt.err (!%p685_p5)
}
 0x1e8   : > { %s689_s7 = scalar_lea.hbm %s513_s19, 128  ;;  %s693_s12 = scalar_lea.hbm %s923_s6, 256 }
 0x1e9   : > { %p690_p6 = scmp.ne.s32.totalorder %s513_s19, %s689_s7  ;;  %p694_p10 = scmp.lt.s32.totalorder %s513_s19, %s923_s6 }
 0x1ea   : > { %p695_p11 = scmp.lt.s32.totalorder %s693_s12, %s689_s7 }
 0x1eb   : > { %p691_p7 = pnand %p690_p6, %p838_p4 }
 0x1ec   : > { %p696_p12 = por %p695_p11, %p694_p10 }
 0x1ed   : > { %p692_p9 = pneg %p691_p7 }
 0x1ef   : > { %p697_p13 = pnand %p696_p12, %p692_p9 }
 0x1f1   : > { %700 = shalt.err (!%p697_p13)
}
 0x1f2   : > { %605 = dma.vmem_to_hbm [thread:$0]  (%p838_p4), %s516_s16, 128, %s513_s19, %s501_s20  }
 0x1f3 PF: > { %p611_p0 = scmp.ge.s32.totalorder %s751_s25, 2  ;;  %s527_s15 = sand.u32 1, %s731_s21  }
 0x1f4   : > { %s528_s17 = scalar_lea.sflag [#allocation5], %s527_s15 }
 0x1f5   : > { %p608_p1 = pnand %p611_p0, %p845_p8 }
 0x1f7   : > { %p609_p2 = pneg %p608_p1 }
 0x1f9   : > { %726 = dma.done.wait (%p609_p2), %s528_s17, 128  }
 0x1fa   : > { %728 = vsyncadd (%p609_p2), %s528_s17, 4294967168  ;;  %s19_s25 = sadd.s32 1, %s751_s25   ;;  %s926_s21 = smov %s735_s1 }
 0x1fb   : > { %p16_p3 = scmp.ge.s32.totalorder %s19_s25, 4   ;;  %s927_s1 = smov %s739_s22 }
 0x1fc   : > { %s928_s22 = smov %s851_s9  ;;  %s929_s23 = smov %s747_s24 }
 0x1fd   : > { %s930_s24 = smov %s932_s28  ;;  %18 = sbr.rel (!%p16_p3) target bundleno = 4 (0x4), region = 91 }
 0x202   :  { %533 = vsyncpa [#allocation5], 1 }
 0x203   :  { %535 = vsyncpa [#allocation5 + $0x1], 1 }

// kernel: tpu_custom_call.1
= control target key start
LH: loop header
LB: loop body
LE: loop exit
PB: predicated region body
PF: predicated region fallthrough
CT: control target
= control target key end

     0   :  { %11 = vsyncpa [#allocation5], 0  ;;  %s917_s0 = inlined_call_operand.vmem [shape: f32[2,8,16], index: 0, kind: input, shape index: {}]   ;;  %s918_s1 = inlined_call_operand.vmem [shape: f32[1,8,128], index: 1, kind: input, shape index: {}]   ;;  %s919_s2 = inlined_call_operand.vmem [shape: f32[8,3], index: 2, kind: input, shape index: {}]   ;;  %s920_s3 = inlined_call_operand.vmem [shape: f32[8,3], index: 3, kind: input, shape index: {}]   ;;  %s921_s4 = inlined_call_operand.vmem [shape: f32[8,8], index: 4, kind: input, shape index: {}]   ;;  %s922_s5 = inlined_call_operand.vmem [shape: f32[8,1], index: 5, kind: input, shape index: {}]   ;;  %s923_s6 = inlined_call_operand.hbm [shape: f32[2,8,16], index: 6, kind: output, shape index: {}]  }
   0x1   :  { %13 = vsyncpa [#allocation5 + $0x1], 0  ;;  %s798_s21 = smov 0   ;;  %s800_s1 = smov 0  }
   0x2   :  { %s802_s22 = smov 0   ;;  %s804_s23 = smov 0  }
   0x3   :  { %s806_s24 = smov 0   ;;  %s808_s25 = smov 0  }
   0x4 LB: > { %s586_s26 = sadd.s32 4294967295, %s751_s25   ;;  %s587_s27 = sadd.s32 4294967294, %s751_s25   ;;  %s751_s25 = sphi %s808_s25, %s19_s25   ;;  %s747_s24 = sphi %s806_s24, %s930_s24   ;;  %s743_s23 = sphi %s804_s23, %s929_s23   ;;  %s739_s22 = sphi %s802_s22, %s928_s22   ;;  %s735_s1 = sphi %s800_s1, %s927_s1   ;;  %s731_s21 = sphi %s798_s21, %s926_s21  }
   0x5   : > { %s31_s28 = sadd.s32 1, %s747_s24  ;;  %s173_s29 = sadd.s32 1, %s739_s22 }
   0x6   : > { %p33_p0 = scmp.ge.s32.totalorder %s31_s28, 2  ;;  %p183_p1 = scmp.ne.s32.totalorder %s739_s22, %s735_s1 }
   0x7   : > { %p184_p2 = scmp.eq.s32.totalorder %s586_s26, 1  ;;  %p189_p3 = scmp.ne.s32.totalorder %s735_s1, %s731_s21 }
   0x8   : > { %s932_s28 = smov (%p33_p0, %s31_s28), 0  ;;  %p190_p5 = scmp.eq.s32.totalorder %s587_s27, 1 }
   0x9   : > { %p838_p4 = por %p184_p2, %p183_p1  ;;  %s168_s7 = ssub.s32 %s747_s24, %s932_s28 }
   0xa   : > { %p590_p6 = scmp.ge.s32.totalorder %s751_s25, 1  ;;  %p171_p7 = scmp.eq.s32.totalorder %s168_s7, 0 }
   0xb   : > { %p845_p8 = por %p190_p5, %p189_p3  ;;  %p233_p9 = scmp.lt.s32.totalorder %s751_s25, 3 }
   0xc   : > { %s851_s9 = scalar_select %p171_p7, %s739_s22, %s173_s29  }
   0xd   : > { %p234_p10 = pnand %p590_p6, %p233_p9 }
   0xe   : > { %p265_p11 = scmp.lt.s32.totalorder (!%p234_p10), %s743_s23, 1  ;;  %s757_s14 = smov (!%p234_p10), 1  }
   0xf   : > { %237 = sbr.rel (%p234_p10) target bundleno = 499 (0x1f3), region = 44  ;;  %s758_s18 = smov (!%p234_p10), 127  }
  0x10   : > { %s759_s26 = smov (!%p234_p10), 3   ;;  %s761_s27 = smov (!%p234_p10), 125  }
  0x14   : > { %v303_v0 = vld [vmem:[%s919_s2] sm:$0xff]  ;;  %v753_v1 = vmov 2   ;;  %v754_v2 = vmov 0   ;;  %s266_s12 = scalar_select %p265_p11, %s743_s23, 1  ;;  %v755_v3 = vmov 0.0   ;;  %vm280_vm0 = vcmask 130048  }
  0x15   : > { %671 = vset.pattern.permute.xlu1 %v753_v1  ;;  %669 = vset.pattern.permute.xlu0 %v754_v2  ;;  %v756_v4 = vmov 1   ;;  %vm297_vm1 = vcmask 1047680   ;;  %v386_v7 = vld [vmem:[%s920_s3] sm:$0xff]  ;;  %v310_v8 = vlaneseq  ;;  %vm760_vm5 = vmmov 0  }
  0x16   : > { %345 = vperm.xlu1 %671, %v303_v0   ;;  %318 = vperm.xlu0 %669, %v303_v0   ;;  %s592_s13 = sshll.u32 %s266_s12, 3  ;;  %v418_v27 = vld [vmem:[%s922_s5] sm:$0xff]  ;;  %vm424_vm8 = vcmask 64512   ;;  %s262_s12 = sand.u32 1, %s735_s1  }
  0x17   : > { %600 = vmatprep.subr.mxu0 %v755_v3  ;;  %s271_s17 = scalar_lea.vmem %s917_s0, %s592_s13  ;;  %v311_v11 = vand.u32 127, %v310_v8  ;;  %602 = vmatprep.mubr.msk.f32.mxu0 %vm760_vm5, %v755_v3  ;;  %v417_v42 = vld [vmem:[%s921_s4] sm:$0xff]  ;;  %s591_s13 = sshll.u32 %s262_s12, 3 }
  0x18   : > { %v861_v5 = vld [vmem:[%s271_s17] sm:$0xff]  ;;  %s264_s15 = scalar_lea.vmem [#allocation4], %s591_s13  ;;  %s501_s20 = scalar_lea.sflag [#allocation5], %s262_s12 }
  0x19   : > { %281 = vst.msk [vmem:[#allocation2 + $0x8] sm:$0xff] %vm280_vm0, %v861_v5  ;;  %vm312_vm2 = vcmp.lt.s32.totalorder %v311_v11, 1  ;;  %v354_v14 = vadd.s32 128, %v311_v11  ;;  %vm340_vm3 = vcmp.lt.s32.totalorder %v311_v11, 127  ;;  %vm391_vm6 = vcmp.lt.s32.totalorder %v311_v11, 3  ;;  %s515_s16 = sshll.u32 %s264_s15, 4  ;;  %s516_s16 = int_to_ptr.vmem [resolvable:$true] %s515_s16 }
  0x1a   : > { %670 = vset.pattern.permute.xlu0 %v756_v4  ;;  %304 = vrot.lane.b32.xlu1 %v755_v3, %s757_s14  ;;  %298 = vst.msk [vmem:[#allocation2 + $0x8] sm:$0xff] %vm297_vm1, %v755_v3  ;;  %vm409_vm7 = vcmp.lt.s32.totalorder %v311_v11, 125 }
  0x1b   : > { %325 = vperm.xlu0 %670, %v303_v0   ;;  %673 = vset.pattern.permute.xlu1 %v756_v4  ;;  %v360_v20 = vadd.s32 4294967168, %v354_v14 }
  0x1d   : > { %vm366_vm4 = vcmp.lt.s32.totalorder %v360_v20, 16 }
  0x1f   : > { %672 = vset.pattern.permute.xlu0 %v754_v2 }
  0x21   : > { %v301_v6 = vld [vmem:[#allocation2 + $0x8] sm:$0xff] }
  0x22   : > { %306 = vrot.lane.b32.xlu1 %v301_v6, %s757_s14  ;;  %336 = vrot.lane.b32.xlu0 %v301_v6, %s758_s18  ;;  %s595_s14 = sshll.u32 %s743_s23, 7  ;;  %s762_s23 = smov [#allocation4]  }
  0x23   : > { %s513_s19 = scalar_lea.hbm %s923_s6, %s595_s14 }
  0x26   : > { %338 = vrot.lane.b32.xlu1 %v755_v3, %s758_s18  ;;  %395 = vperm.xlu0 %672, %v386_v7  }
  0x2a   : > { %400 = vperm.xlu1 %673, %v386_v7   ;;  %387 = vrot.lane.b32.xlu0 %v755_v3, %s759_s26 }
  0x2e   : > { %674 = vset.pattern.permute.xlu1 %v753_v1 }
  0x2f   : > { %412 = vperm.xlu1 %674, %v386_v7  }
  0x91   : > { %v346_v9 = vpop.permute.xlu1 %345  ;;  %v319_v10 = vpop.permute.xlu0 %318 }
  0x95   : > { %v305_v12 = vpop.permute.xlu1 %304 }
  0x96   : > { %v326_v13 = vpop.permute.xlu0 %325 }
  0x97   : > { %v329_v17 = vmul.f32 %v326_v13, %v301_v6 }
  0x99   : > { %v307_v15 = vpop.permute.xlu1 %306 }
  0x9a   : > { %v314_v16 = vsel %vm312_vm2, %v305_v12, %v307_v15  ;;  %v337_v19 = vpop.permute.xlu0 %336 }
  0x9b   : > { %v322_v18 = vmul.f32 %v319_v10, %v314_v16 }
  0x9d   : > { %v339_v21 = vpop.permute.xlu1 %338  ;;  %v332_v23 = vadd.f32 %v329_v17, %v322_v18 }
  0x9e   : > { %v341_v22 = vsel %vm340_vm3, %v337_v19, %v339_v21 }
  0x9f   : > { %v349_v24 = vmul.f32 %v346_v9, %v341_v22 }
  0xa1   : > { %v352_v25 = vadd.f32 %v349_v24, %v332_v23  ;;  %v396_v29 = vpop.permute.xlu0 %395 }
  0xa3   : > { %v384_v26 = vsel %vm366_vm4, %v352_v25, 0.0 }
  0xa4   : > { %405 = vrot.lane.b32.xlu0 %v384_v26, %s761_s27  ;;  %389 = vrot.lane.b32.xlu1 %v384_v26, %s759_s26  ;;  %s675_s26 = scalar_lea.vmem %s516_s16, 128 }
  0xa5   : > { %v401_v28 = vpop.permute.xlu1 %400  ;;  %v388_v31 = vpop.permute.xlu0 %387  ;;  %p676_p12 = scmp.ne.s32.totalorder %s516_s16, %s675_s26 }
  0xa6   : > { %v403_v35 = vmul.f32 %v401_v28, %v384_v26 }
  0xa7   : > { %p677_p13 = pnand %p676_p12, %p838_p4 }
  0xa8   : > { %421 = vperm.xlu0 %672, %v418_v27   ;;  %407 = vrot.lane.b32.xlu1 %v755_v3, %s761_s27  ;;  %s679_s27 = sshll.u32 %s762_s23, 4  ;;  %s680_s27 = int_to_ptr.vmem [resolvable:$false] %s679_s27 }
  0xa9   : > { %p678_p0 = pneg %p677_p13  ;;  %s681_s29 = scalar_lea.vmem %s680_s27, 256 }
  0xaa   : > { %v413_v30 = vpop.permute.xlu1 %412  ;;  %p682_p1 = scmp.lt.s32.totalorder %s516_s16, %s680_s27  ;;  %p683_p2 = scmp.lt.s32.totalorder %s681_s29, %s675_s26 }
  0xac   : > { %p684_p3 = por %p683_p2, %p682_p1 }
  0xae   : > { %p685_p5 = pnand %p684_p3, %p678_p0 }
 0x116   : > { %v390_v32 = vpop.permute.xlu1 %389  ;;  %v406_v36 = vpop.permute.xlu0 %405 }
 0x117   : > { %v392_v33 = vsel %vm391_vm6, %v388_v31, %v390_v32 }
 0x118   : > { %v398_v34 = vmul.f32 %v396_v29, %v392_v33 }
 0x11a   : > { %v408_v37 = vpop.permute.xlu1 %407  ;;  %v404_v40 = vadd.f32 %v403_v35, %v398_v34 }
 0x11b   : > { %v410_v38 = vsel %vm409_vm7, %v406_v36, %v408_v37 }
 0x11c   : > { %v415_v39 = vmul.f32 %v413_v30, %v410_v38 }
 0x11e   : > { %v416_v41 = vadd.f32 %v415_v39, %v404_v40 }
 0x120   : > { %601 = vmatpush3.msra.mxu0 %v416_v41 }
 0x121   : > { %603 = vmatmul.mubr.msk.f32.vlgmr.msra.gmra.mxu0 %vm424_vm8, %v417_v42 }
 0x123   : > { %v422_v43 = vpop.permute.xlu0 %421 }
 0x1e1   : > { %v494_v44 = vpop.f32.mrf.mxu0 }
 0x1e2   : > { %v495_v45 = vadd.f32 %v494_v44, %v422_v43 }
 0x1e3   : > { %v604_v46 = vpop.f32.mrf.mxu0 }
 0x1e4   : > { %v498_v47 = vmul.f32 %v495_v45, %v861_v5 }
 0x1e6   : > { %499 = vst.msk [vmem:[%s264_s15] sm:$0xff] %vm280_vm0, %v498_v47 }
 0x1e7   : > { %688 = shalt.err (!%p685_p5)
}
 0x1e8   : > { %s689_s7 = scalar_lea.hbm %s513_s19, 128  ;;  %s693_s12 = scalar_lea.hbm %s923_s6, 256 }
 0x1e9   : > { %p690_p6 = scmp.ne.s32.totalorder %s513_s19, %s689_s7  ;;  %p694_p10 = scmp.lt.s32.totalorder %s513_s19, %s923_s6 }
 0x1ea   : > { %p695_p11 = scmp.lt.s32.totalorder %s693_s12, %s689_s7 }
 0x1eb   : > { %p691_p7 = pnand %p690_p6, %p838_p4 }
 0x1ec   : > { %p696_p12 = por %p695_p11, %p694_p10 }
 0x1ed   : > { %p692_p9 = pneg %p691_p7 }
 0x1ef   : > { %p697_p13 = pnand %p696_p12, %p692_p9 }
 0x1f1   : > { %700 = shalt.err (!%p697_p13)
}
 0x1f2   : > { %605 = dma.vmem_to_hbm [thread:$0]  (%p838_p4), %s516_s16, 128, %s513_s19, %s501_s20  }
 0x1f3 PF: > { %p611_p0 = scmp.ge.s32.totalorder %s751_s25, 2  ;;  %s527_s15 = sand.u32 1, %s731_s21  }
 0x1f4   : > { %s528_s17 = scalar_lea.sflag [#allocation5], %s527_s15 }
 0x1f5   : > { %p608_p1 = pnand %p611_p0, %p845_p8 }
 0x1f7   : > { %p609_p2 = pneg %p608_p1 }
 0x1f9   : > { %726 = dma.done.wait (%p609_p2), %s528_s17, 128  }
 0x1fa   : > { %728 = vsyncadd (%p609_p2), %s528_s17, 4294967168  ;;  %s19_s25 = sadd.s32 1, %s751_s25   ;;  %s926_s21 = smov %s735_s1 }
 0x1fb   : > { %p16_p3 = scmp.ge.s32.totalorder %s19_s25, 4   ;;  %s927_s1 = smov %s739_s22 }
 0x1fc   : > { %s928_s22 = smov %s851_s9  ;;  %s929_s23 = smov %s747_s24 }
 0x1fd   : > { %s930_s24 = smov %s932_s28  ;;  %18 = sbr.rel (!%p16_p3) target bundleno = 4 (0x4), region = 91 }
 0x202   :  { %533 = vsyncpa [#allocation5], 1 }
 0x203   :  { %535 = vsyncpa [#allocation5 + $0x1], 1 }

</bundles_post_ra>
